<compile_context>
chip_gen: v7x
topology: tpu7x:2x2x1
jax: 0.10.0
libtpu: 0.0.40
codegen_flags: <defaults>
</compile_context>

<pallas_src>
import jax
import jax.numpy as jnp
from jax.experimental import pallas as pl
from jax.experimental.pallas import tpu as pltpu


_LANE = 128
_SUBLANE = 8
_MXU_ROWS = 256            # v6e/v7x MXU tile rows; harmless over-alignment on v5e
_TM_TARGET = 2048          # mem-bound tiles keep improving up to ~1-2k rows
_SMALL_PROBLEM_FLOPS = 2_000_000   # 2*M*K*N below this -> plain XLA dot


def _round_up(x, m):
    return ((x + m - 1) // m) * m


def _round_down(x, m):
    return max(m, (x // m) * m)


def _vmem_limits():
    """(scoped vmem limit, tile-buffer budget), adapted to the TPU generation."""
    try:
        cap = int(pltpu.get_tpu_info().vmem_capacity_bytes)
    except Exception:
        cap = 64 * 1024 * 1024                       # conservative: v7x per-TC VMEM
    limit = min((cap * 3) // 4, 112 * 1024 * 1024)   # ~48 MiB v7x, ~96 MiB v5e/v6e
    budget = limit - 8 * 1024 * 1024                 # headroom for internal scratch
    return limit, budget


def _tile_bytes(tm, tn, K, dsize, w_bufs):
    acc = tm * tn * 4                      # f32 matmul accumulator (pre-cast)
    x_t = 2 * tm * K * dsize               # double-buffered input row tile
    o_t = 2 * tm * tn * dsize              # double-buffered output tile
    w_t = w_bufs * (K * tn + tn) * dsize   # weight strip + bias row
    return acc + x_t + o_t + w_t


def _choose_tiles(M, K, N, dsize, budget):
    """Pick (tm, tn, weight_buffers) for y = x @ W + b with x:(M,K), W:(K,N)."""
    # --- N (lane) tiling: keep the whole weight resident when it fits. ---
    tn, w_bufs = N, 1
    if _tile_bytes(_SUBLANE, N, K, dsize, 1) > budget and N > _LANE:
        # Weight too big to keep resident: stream lane-multiple column strips.
        w_bufs = 2
        tn = _round_down(min(N, 4 * _LANE), _LANE)
        while tn > _LANE and _tile_bytes(_MXU_ROWS, tn, K, dsize, 2) > budget:
            tn = _round_down(tn // 2, _LANE)
    # TODO(synk): for very large K (K*tn strip itself exceeding VMEM) add a K
    # grid axis with an f32 accumulator + pl.when init/finalize.

    # --- M (row) tiling: grow toward _TM_TARGET, MXU-row aligned. ---
    m_cap = _round_up(M, _SUBLANE)
    tm = min(_TM_TARGET, m_cap)
    tm = _round_down(tm, _MXU_ROWS) if tm >= _MXU_ROWS else _round_up(tm, _SUBLANE)
    while tm > _SUBLANE and _tile_bytes(tm, tn, K, dsize, w_bufs) > budget:
        tm //= 2
        tm = _round_down(tm, _MXU_ROWS) if tm >= _MXU_ROWS else _round_up(tm, _SUBLANE)

    # Keep >= 2 row blocks when there is enough work so v7x's two TensorCores
    # both get a slice (one extra ~0.35us grid step on single-TC chips).
    if pl.cdiv(M, tm) == 1 and M >= 2 * _MXU_ROWS:
        tm = _round_down(max(_MXU_ROWS, tm // 2), _MXU_ROWS)

    return tm, tn, w_bufs


def _td_linear_kernel(x_ref, w_ref, b_ref, o_ref):
    # x_ref: (tm, K) row tile, w_ref: (K, tn) weight strip, b_ref: (1, tn),
    # o_ref: (tm, tn).  f32 accumulation on the MXU, cast on store.
    acc = jnp.dot(x_ref[...], w_ref[...], preferred_element_type=jnp.float32)
    acc = acc + b_ref[...].astype(jnp.float32)
    o_ref[...] = acc.astype(o_ref.dtype)


def _linear_pallas(x2d, weight_t, bias_row, *, tn_override=None):
    """y = x2d @ weight_t + bias_row via a Pallas TPU kernel.

    x2d: (M, K), weight_t: (K, N), bias_row: (1, N).  No padding / slicing:
    ragged final row/column blocks are clipped by Pallas on the output write.
    """
    M, K = x2d.shape
    K2, N = weight_t.shape
    assert K == K2, (K, K2)
    dtype = x2d.dtype
    dsize = jnp.dtype(dtype).itemsize

    vmem_limit, budget = _vmem_limits()
    tm, tn, _ = _choose_tiles(M, K, N, dsize, budget)
    if tn_override is not None:              # testing hook: force the N-tiled path
        tn = tn_override

    nm = pl.cdiv(M, tm)
    nn = pl.cdiv(N, tn)

    # Weight / bias stay resident (single-buffered) when the whole N fits in
    # one strip; otherwise stream strips with default double-buffering.
    if nn == 1:
        w_spec = pl.BlockSpec((K, tn), lambda i, j: (0, j),
                              pipeline_mode=pl.Buffered(1))
        b_spec = pl.BlockSpec((1, tn), lambda i, j: (0, j),
                              pipeline_mode=pl.Buffered(1))
    else:
        w_spec = pl.BlockSpec((K, tn), lambda i, j: (0, j))
        b_spec = pl.BlockSpec((1, tn), lambda i, j: (0, j))

    cost = pl.CostEstimate(
        flops=2 * M * K * N,
        transcendentals=0,
        bytes_accessed=(M * K + K * N + M * N + N) * dsize,
    )

    return pl.pallas_call(
        _td_linear_kernel,
        out_shape=jax.ShapeDtypeStruct((M, N), dtype),
        grid_spec=pltpu.PrefetchScalarGridSpec(
            num_scalar_prefetch=0,
            grid=(nm, nn),
            in_specs=[
                pl.BlockSpec((tm, K), lambda i, j: (i, 0)),   # streamed row tiles
                w_spec,
                b_spec,
            ],
            out_specs=pl.BlockSpec((tm, tn), lambda i, j: (i, j)),
        ),
        compiler_params=pltpu.CompilerParams(
            dimension_semantics=("parallel", "parallel"),
            vmem_limit_bytes=vmem_limit,
        ),
        cost_estimate=cost,
    )(x2d, weight_t, bias_row)


def make_time_distributed_linear(weight, bias, *, batch_first=True,
                                 force_pallas=False, tn_override=None):
    """Factory for TimeDistributed(nn.Linear(K, N)).

    weight: (N, K)  -- PyTorch Linear layout; transposed ONCE here so repeated
                       calls inside an LSTM scan do not re-materialize it.
    bias:   (N,)
    Returns apply(x) with x: (..., K) -> (..., N), matching the module.
    """
    N_out, K = weight.shape
    weight_t = jnp.asarray(weight).T                 # (K, N), hoisted out of calls
    bias_row = jnp.asarray(bias).reshape(1, N_out)   # (1, N)

    def linear2d(x2d):
        M = x2d.shape[0]
        tiny = (2 * M * K * N_out) < _SMALL_PROBLEM_FLOPS
        narrow = (K <= _LANE) and (N_out <= _LANE)   # MXU/vregs badly under-used
        if (tiny or narrow) and not force_pallas:
            return (jnp.dot(x2d, weight_t) + bias_row).astype(x2d.dtype)
        return _linear_pallas(x2d, weight_t, bias_row, tn_override=tn_override)

    def apply(x):
        if x.ndim <= 2:
            # "if len(x.size()) <= 2: return self.module(x)"
            assert x.shape[-1] == K, (x.shape, K)
            if x.ndim == 1:
                return linear2d(x.reshape(1, K)).reshape(N_out)
            return linear2d(x)
        x2d = x.reshape(-1, K)                       # x.contiguous().view(-1, K)
        y2d = linear2d(x2d)
        if batch_first:
            # y.view(x.size(0), -1, y.size(-1))
            return y2d.reshape(x.shape[0], -1, N_out)
        # y.view(-1, x.size(1), y.size(-1))
        return y2d.reshape(-1, x.shape[1], N_out)

    return apply


def time_distributed_linear(x, weight, bias, *, batch_first=True,
                            force_pallas=False, tn_override=None):
    """One-shot convenience wrapper (prefer the factory inside scan loops)."""
    return make_time_distributed_linear(
        weight, bias, batch_first=batch_first,
        force_pallas=force_pallas, tn_override=tn_override)(x)


if __name__ == "__main__":
    key = jax.random.PRNGKey(0)
    kx, kw, kb, kx2, kw2, kb2, kx3 = jax.random.split(key, 7)

    # PyTorch shapes: x (B, T, F_in), Linear weight (F_out, F_in), bias (F_out,)
    B, T, F_IN, F_OUT = 2, 8, 32, 64
    x = jax.random.normal(kx, (B, T, F_IN), dtype=jnp.float32)
    weight = jax.random.normal(kw, (F_OUT, F_IN), dtype=jnp.float32) * 0.1
    bias = jax.random.normal(kb, (F_OUT,), dtype=jnp.float32) * 0.1

    # 1) Small demo shape -- force the Pallas path (full-dim N=64 blocks,
    #    single grid step, resident weight).
    y = time_distributed_linear(x, weight, bias, batch_first=True,
                                force_pallas=True)
    y = jax.block_until_ready(y)
    y_ref = (x.reshape(-1, F_IN) @ weight.T + bias).reshape(B, T, F_OUT)
    assert y.shape == (B, T, F_OUT), y.shape
    assert jnp.allclose(y, y_ref, atol=1e-5, rtol=1e-5)

    # 2) Non-tile-divisible M (600 rows -> tm=512, ragged last block clipped by
    #    Pallas -- no padding, no post-slice).
    B2, T2 = 3, 200
    x2 = jax.random.normal(kx2, (B2, T2, F_IN), dtype=jnp.float32)
    y2 = time_distributed_linear(x2, weight, bias, batch_first=True,
                                 force_pallas=True)
    y2 = jax.block_until_ready(y2)
    y2_ref = (x2.reshape(-1, F_IN) @ weight.T + bias).reshape(B2, T2, F_OUT)
    assert y2.shape == (B2, T2, F_OUT), y2.shape
    assert jnp.allclose(y2, y2_ref, atol=1e-4, rtol=1e-4)

    # 3) Auto-dispatch (narrow K/N falls back to XLA dot), batch_first=False.
    x3 = jnp.transpose(x, (1, 0, 2))      # (T, B, F_in)
    y3 = time_distributed_linear(x3, weight, bias, batch_first=False)
    y3 = jax.block_until_ready(y3)
    y3_ref = (x3.reshape(-1, F_IN) @ weight.T + bias).reshape(-1, B, F_OUT)
    assert jnp.allclose(y3, y3_ref, atol=1e-5, rtol=1e-5)

    # 4) Exercise the N-tiled path (weight streamed in 128-lane strips) and the
    #    2-D grid: K=64, N=256, M=600, tn forced to 128 -> grid (2, 2).
    F_IN4, F_OUT4 = 64, 256
    x4 = jax.random.normal(kx3, (B2, T2, F_IN4), dtype=jnp.float32)
    w4 = jax.random.normal(kw2, (F_OUT4, F_IN4), dtype=jnp.float32) * 0.1
    b4 = jax.random.normal(kb2, (F_OUT4,), dtype=jnp.float32) * 0.1
    td4 = make_time_distributed_linear(w4, b4, batch_first=True,
                                       force_pallas=True, tn_override=128)
    y4 = jax.block_until_ready(td4(x4))
    y4_ref = (x4.reshape(-1, F_IN4) @ w4.T + b4).reshape(B2, T2, F_OUT4)
    assert y4.shape == (B2, T2, F_OUT4), y4.shape
    assert jnp.allclose(y4, y4_ref, atol=1e-4, rtol=1e-4)

    print("KERNEL_OK")
</pallas_src>

<mosaic_0001>
module attributes {stable_mosaic.version = 11 : i64} {
  func.func @_td_linear_kernel(%arg0: i32, %arg1: i32, %arg2: memref<16x32xf32, #tpu.memory_space<vmem>>, %arg3: memref<32x64xf32, #tpu.memory_space<vmem>>, %arg4: memref<1x64xf32, #tpu.memory_space<vmem>>, %arg5: memref<16x64xf32, #tpu.memory_space<vmem>>) attributes {dimension_semantics = [#tpu.dimension_semantics<parallel>, #tpu.dimension_semantics<parallel>], iteration_bounds = array<i64: 1, 1>, scalar_prefetch = 0 : i64, scratch_operands = 0 : i64, tpu.core_type = #tpu.core_type<tc>, window_params = [{transform_indices = @transform_0, window_bounds = array<i64: 16, 32>}, {pipeline_mode = #tpu.pipeline_mode<synchronous>, transform_indices = @transform_1, window_bounds = array<i64: 32, 64>}, {pipeline_mode = #tpu.pipeline_mode<synchronous>, transform_indices = @transform_2, window_bounds = array<i64: 1, 64>}, {transform_indices = @transform_3, window_bounds = array<i64: 16, 64>}]} {
    %c0 = arith.constant 0 : index
    %c0_0 = arith.constant 0 : index
    %0 = vector.load %arg2[%c0, %c0_0] : memref<16x32xf32, #tpu.memory_space<vmem>>, vector<16x32xf32>
    %c0_1 = arith.constant 0 : index
    %c0_2 = arith.constant 0 : index
    %1 = vector.load %arg3[%c0_1, %c0_2] : memref<32x64xf32, #tpu.memory_space<vmem>>, vector<32x64xf32>
    %cst = arith.constant dense<0.000000e+00> : vector<16x64xf32>
    %2 = tpu.matmul %0, %1, %cst {dimension_numbers = #tpu.dot_dimension_numbers<[1], [0], [0], [1], [0, 0, 1, 1], [], []>} : vector<16x32xf32>, vector<32x64xf32>, vector<16x64xf32> -> vector<16x64xf32>
    %c0_3 = arith.constant 0 : index
    %c0_4 = arith.constant 0 : index
    %3 = vector.load %arg4[%c0_3, %c0_4] : memref<1x64xf32, #tpu.memory_space<vmem>>, vector<1x64xf32>
    %4 = vector.broadcast %3 : vector<1x64xf32> to vector<16x64xf32>
    %5 = arith.addf %2, %4 : vector<16x64xf32>
    %c0_5 = arith.constant 0 : index
    %c0_6 = arith.constant 0 : index
    %6 = vector.load %arg5[%c0_5, %c0_6] : memref<16x64xf32, #tpu.memory_space<vmem>>, vector<16x64xf32>
    tpu.vector_store %arg5[%c0_5, %c0_6], %5 {strides = array<i32>} : memref<16x64xf32, #tpu.memory_space<vmem>>, vector<16x64xf32>,
    return
  }
  func.func @transform_0(%arg0: i32, %arg1: i32) -> (i32, i32) {
    %c0_i32 = arith.constant 0 : i32
    %c0_i32_0 = arith.constant 0 : i32
    return %arg0, %c0_i32 : i32, i32
  }
  func.func @transform_1(%arg0: i32, %arg1: i32) -> (i32, i32) {
    %c0_i32 = arith.constant 0 : i32
    %c0_i32_0 = arith.constant 0 : i32
    return %c0_i32, %arg1 : i32, i32
  }
  func.func @transform_2(%arg0: i32, %arg1: i32) -> (i32, i32) {
    %c0_i32 = arith.constant 0 : i32
    %c0_i32_0 = arith.constant 0 : i32
    return %c0_i32, %arg1 : i32, i32
  }
  func.func @transform_3(%arg0: i32, %arg1: i32) -> (i32, i32) {
    %c0_i32 = arith.constant 0 : i32
    return %arg0, %arg1 : i32, i32
  }
}

</mosaic_0001>

<bundles_post_ra>
// kernel: tpu_custom_call.1
= control target key start
LH: loop header
LB: loop body
LE: loop exit
PB: predicated region body
PF: predicated region fallthrough
CT: control target
= control target key end

     0   :  { %8 = vsyncpa [#allocation3], 0  ;;  %s337_s0 = inlined_call_operand.hbm [shape: f32[16,32], index: 0, kind: input, shape index: {}]   ;;  %s338_s1 = inlined_call_operand.hbm [shape: f32[32,64], index: 1, kind: input, shape index: {}]   ;;  %s339_s2 = inlined_call_operand.vmem [shape: f32[1,64], index: 2, kind: input, shape index: {}]   ;;  %s340_s3 = inlined_call_operand.hbm [shape: f32[16,64], index: 3, kind: output, shape index: {}]  }
   0x1   :  { %9 = vsyncpa [#allocation6], 0 }
   0x2   :  { %10 = vsyncpa [#allocation4], 0  ;;  %s264_s12 = smov [#allocation2]   ;;  %s192_s16 = scalar_lea.hbm %s337_s0, 256 }
   0x3   :  { %s16_s13 = sshll.u32 %s264_s12, 4  ;;  %p193_p0 = scmp.ne.s32.totalorder %s337_s0, %s192_s16  ;;  %s17_s13 = int_to_ptr.vmem [resolvable:$true] %s16_s13 }
   0x4   :  { %p196_p1 = scmp.lt.u32.totalorder %s192_s16, %s337_s0 }
   0x6   :  { %p198_p2 = pnand %p196_p1, %p193_p0 }
   0x8   :  { %201 = shalt.err (!%p198_p2)
}
   0x9   :  { %s202_s21 = scalar_lea.vmem %s17_s13, 256  ;;  %p207_p4 = scmp.lt.s32.totalorder %s17_s13, %s17_s13 }
   0xa   :  { %p203_p3 = scmp.ne.s32.totalorder %s17_s13, %s202_s21  ;;  %p208_p5 = scmp.lt.s32.totalorder %s202_s21, %s202_s21 }
   0xc   :  { %p209_p6 = por %p208_p5, %p207_p4 }
   0xe   :  { %p210_p7 = pnand %p209_p6, %p203_p3 }
  0x10   :  { %213 = shalt.err (!%p210_p7)
}
  0x11   :  { %s265_s22 = smov 128   ;;  %s266_s23 = smov 8  }
  0x12   :  { %22 = dma.hbm_to_vmem [thread:$0]  %s337_s0, 256, %s17_s13, [#allocation3], %s265_s22, %s265_s22, %s266_s23  }
  0x13   :  { %s267_s26 = smov [#allocation5]   ;;  %s214_s30 = scalar_lea.hbm %s338_s1, 512 }
  0x14   :  { %s28_s27 = sshll.u32 %s267_s26, 4  ;;  %p215_p8 = scmp.ne.s32.totalorder %s338_s1, %s214_s30  ;;  %s29_s27 = int_to_ptr.vmem [resolvable:$true] %s28_s27 }
  0x15   :  { %p218_p9 = scmp.lt.u32.totalorder %s214_s30, %s338_s1 }
  0x17   :  { %p220_p10 = pnand %p218_p9, %p215_p8 }
  0x19   :  { %223 = shalt.err (!%p220_p10)
}
  0x1a   :  { %s224_s8 = scalar_lea.vmem %s29_s27, 512  ;;  %p229_p12 = scmp.lt.s32.totalorder %s29_s27, %s29_s27 }
  0x1b   :  { %p225_p11 = scmp.ne.s32.totalorder %s29_s27, %s224_s8  ;;  %p230_p13 = scmp.lt.s32.totalorder %s224_s8, %s224_s8 }
  0x1d   :  { %p231_p0 = por %p230_p13, %p229_p12 }
  0x1f   :  { %p232_p1 = pnand %p231_p0, %p225_p11 }
  0x21   :  { %235 = shalt.err (!%p232_p1)
}
  0x22   :  { %34 = dma.hbm_to_vmem [thread:$0]  %s338_s1, 512, %s29_s27, [#allocation6], %s265_s22, %s265_s22, %s266_s23  }
  0x23   :  { %258 = dma.done.wait [#allocation3], 256  }
  0x24   :  { %259 = vsyncadd [#allocation3], 4294967040 }
  0x25   :  { %260 = dma.done.wait [#allocation6], 512  }
  0x26   :  { %261 = vsyncadd [#allocation6], 4294966784  ;;  %vm56_vm0 = vcmask 261120   ;;  %v45_v0 = vld [vmem:[#allocation5] sm:$0xff]  ;;  %v46_v1 = vld [vmem:[#allocation5 + $0x8] sm:$0xff]  ;;  %s268_s11 = smov [#allocation7]  }
  0x27   :  { %v47_v2 = vld [vmem:[#allocation5 + $0x10] sm:$0xff]  ;;  %v179_v3 = vpack.c.bf16 %v46_v1, %v45_v0  ;;  %v48_v4 = vld [vmem:[#allocation5 + $0x18] sm:$0xff]  ;;  %s146_s12 = sshll.u32 %s268_s11, 4  ;;  %vm138_vm1 = vcmask 523264   ;;  %s147_s12 = int_to_ptr.vmem [resolvable:$true] %s146_s12 }
  0x28   :  { %v43_v5 = vld [vmem:[#allocation2] sm:$0xff]  ;;  %v183_v6 = vpack.c.bf16 %v48_v4, %v47_v2  ;;  %v44_v7 = vld [vmem:[#allocation2 + $0x8] sm:$0xff]  ;;  %s236_s13 = scalar_lea.vmem %s147_s12, 256  ;;  %p241_p3 = scmp.lt.s32.totalorder %s147_s12, %s147_s12 }
  0x29   :  { %176 = vmatprep.mubr.msk.f32.mxu0 %vm56_vm0, %v43_v5  ;;  %180 = vmatprep.subr.bf16.mxu0 %v179_v3  ;;  %v159_v8 = vld [vmem:[%s339_s2] ss:$0 sm:$0xff]  ;;  %p237_p2 = scmp.ne.s32.totalorder %s147_s12, %s236_s13  ;;  %p242_p4 = scmp.lt.s32.totalorder %s236_s13, %s236_s13 }
  0x2a   :  { %182 = vmatpush3.bf16.msra.mxu0 %v179_v3 }
  0x2b   :  { %184 = vmatprep.subr.bf16.mxu0 %v183_v6  ;;  %p243_p5 = por %p242_p4, %p241_p3 }
  0x2d   :  { %p244_p6 = pnand %p243_p5, %p237_p2 }
  0x2e   :  { %186 = vmatpush3.bf16.msra.mxu0 %v183_v6 }
  0x31   :  { %177 = vmatmul.mubr.msk.f32.vlgmr.msra.gmra.mrb[0].mxu0 %vm56_vm0, %v44_v7 }
 0x104   :  { %v178_v9 = vpop.f32.mrb[0].mxu0 }
 0x105   :  { %v135_v10 = vadd.f32 %v178_v9, %v159_v8  ;;  %v129_v11 = vpop.f32.mrb[1].mxu0 }
 0x106   :  { %v130_v12 = vadd.f32 %v159_v8, %v129_v11 }
 0x107   :  { %140 = vst.msk [vmem:[#allocation7 + $0x8] sm:$0xff] %vm138_vm1, %v135_v10 }
 0x108   :  { %139 = vst.msk [vmem:[#allocation7] sm:$0xff] %vm138_vm1, %v130_v12 }
 0x109   :  { %247 = shalt.err (!%p244_p6)
}
 0x10a   :  { %s248_s2 = scalar_lea.hbm %s340_s3, 256 }
 0x10b   :  { %p249_p7 = scmp.ne.s32.totalorder %s340_s3, %s248_s2  ;;  %p252_p8 = scmp.lt.u32.totalorder %s248_s2, %s340_s3 }
 0x10d   :  { %p254_p9 = pnand %p252_p8, %p249_p7 }
 0x10f   :  { %257 = shalt.err (!%p254_p9)
}
 0x110   :  { %152 = dma.vmem_to_hbm [thread:$0]  %s147_s12, 256, %s340_s3, [#allocation4], %s265_s22, %s265_s22, %s266_s23  }
 0x111   :  { %262 = dma.done.wait [#allocation4], 256  }
 0x112   :  { %263 = vsyncadd [#allocation4], 4294967040 }
 0x113   :  { %156 = vsyncpa [#allocation3], 1 }
 0x114   :  { %157 = vsyncpa [#allocation6], 1 }
 0x115   :  { %158 = vsyncpa [#allocation4], 1 }

</bundles_post_ra>
